<compile_context>
chip_gen: v7x
topology: tpu7x:2x2x1
jax: 0.10.0
libtpu: 0.0.40
codegen_flags: <defaults>
</compile_context>

<pallas_src>
import math
import functools

import jax
import jax.numpy as jnp
from jax.experimental import pallas as pl
from jax.experimental.pallas import tpu as pltpu


def _round_up(a: int, m: int) -> int:
    return (a + m - 1) // m * m


def _gather_kernel(ids_ref, table_hbm, out_ref, row_buf, sem, *, scale, tn):
    # ids_ref:   (N_pad,) int32  SMEM (scalar-prefetched token ids, full array)
    # table_hbm: (V, D)          HBM ref (memory_space=pl.ANY, no auto-DMA)
    # out_ref:   (tn, D)         VMEM output tile
    # row_buf:   (tn, D)         VMEM staging buffer for gathered rows
    # sem:       ()              DMA semaphore shared by all row copies
    base = pl.program_id(0) * tn

    # Issue all per-row DMAs (HBM table row -> VMEM staging row). Every copy
    # is the same (1, D) size, so sharing one semaphore pairs with the waits.
    @pl.loop(0, tn)
    def _start(t):
        row = ids_ref[base + t]
        pltpu.make_async_copy(
            table_hbm.at[pl.ds(row, 1), :],
            row_buf.at[pl.ds(t, 1), :],
            sem,
        ).start()

    # Drain: wait for tn copies of (1, D) each (dummy src/dst, same size).
    @pl.loop(0, tn)
    def _wait(t):
        pltpu.make_async_copy(
            table_hbm.at[pl.ds(0, 1), :],
            row_buf.at[pl.ds(0, 1), :],
            sem,
        ).wait()

    out_ref[...] = (row_buf[...] * scale).astype(out_ref.dtype)


def input_embedding(x, table, *, token_tile=128):
    """x: (B, S) integer token ids; table: (V, D). Returns (B, S, D) = table[x] * sqrt(D)."""
    assert token_tile % 8 == 0, "token_tile must be a multiple of 8 (sublane tiling)"
    b, s = x.shape
    v, d = table.shape
    n = b * s
    scale = math.sqrt(d)

    # Pick tokens-per-grid-step: multiple of 8, capped at token_tile.
    tn = min(token_tile, _round_up(n, 8))
    n_pad = _round_up(n, tn)

    # Flatten ids, clamp (OOB policy: torch raises; we clamp to stay DMA-safe),
    # and pad to a multiple of tn (padding tokens gather row 0, sliced off below).
    ids = jnp.clip(x.reshape(-1).astype(jnp.int32), 0, v - 1)
    if n_pad > n:
        ids = jnp.concatenate([ids, jnp.zeros((n_pad - n,), jnp.int32)])

    kernel = functools.partial(_gather_kernel, scale=scale, tn=tn)
    out_flat = pl.pallas_call(
        kernel,
        out_shape=jax.ShapeDtypeStruct((n_pad, d), table.dtype),
        grid_spec=pltpu.PrefetchScalarGridSpec(
            num_scalar_prefetch=1,                 # ids -> SMEM
            grid=(n_pad // tn,),
            in_specs=[
                pl.BlockSpec(memory_space=pl.ANY),  # table stays in HBM
            ],
            out_specs=pl.BlockSpec((tn, d), lambda i, ids: (i, 0)),
            scratch_shapes=[
                pltpu.VMEM((tn, d), table.dtype),   # row staging buffer
                pltpu.SemaphoreType.DMA(()),        # shared DMA semaphore
            ],
        ),
        compiler_params=pltpu.CompilerParams(
            dimension_semantics=("parallel",),      # shards token tiles across v7x cores
        ),
    )(ids, table)

    return out_flat[:n].reshape(b, s, d)


if __name__ == "__main__":
    # Small shapes consistent with the module: batch=2, seq=8.
    # d_model=128 keeps the output tile lane-dense (D a multiple of 128).
    d_model = 128
    vocab_size = 512
    batch, seq = 2, 8

    key = jax.random.PRNGKey(0)
    k_tab, k_ids = jax.random.split(key)
    # Deterministic "checkpoint": N(0,1) init like nn.Embedding's default.
    table = jax.random.normal(k_tab, (vocab_size, d_model), dtype=jnp.float32)
    x = jax.random.randint(k_ids, (batch, seq), minval=0, maxval=vocab_size,
                           dtype=jnp.int32)

    y = input_embedding(x, table)
    jax.block_until_ready(y)

    # Reference check (plain JAX gather).
    y_ref = table[x] * math.sqrt(d_model)
    assert y.shape == (batch, seq, d_model)
    assert jnp.allclose(y, y_ref, atol=1e-5, rtol=1e-5)

    print("KERNEL_OK")
</pallas_src>

<mosaic_0001>
module attributes {stable_mosaic.version = 11 : i64} {
  func.func @_gather_kernel(%arg0: i32, %arg1: memref<16xi32, #tpu.memory_space<smem>>, %arg2: memref<512x128xf32, #tpu.memory_space<any>>, %arg3: memref<16x128xf32, #tpu.memory_space<vmem>>, %arg4: memref<16x128xf32, #tpu.memory_space<vmem>>, %arg5: memref<!tpu.dma_semaphore, #tpu.memory_space<semaphore_mem>>) attributes {dimension_semantics = [#tpu.dimension_semantics<parallel>], iteration_bounds = array<i64: 1>, scalar_prefetch = 1 : i64, scratch_operands = 2 : i64, tpu.core_type = #tpu.core_type<tc>, window_params = [{}, {transform_indices = @transform_1, window_bounds = array<i64: 16, 128>}]} {
    %c16_i32 = arith.constant 16 : i32
    %0 = arith.muli %arg0, %c16_i32 : i32
    %c0_i32 = arith.constant 0 : i32
    %c16_i32_0 = arith.constant 16 : i32
    %1 = arith.addi %c0_i32, %c16_i32_0 : i32
    %c1_i32 = arith.constant 1 : i32
    scf.for %arg6 = %c0_i32 to %1 step %c1_i32  : i32 {
      %c1_i32_8 = arith.constant 1 : i32
      %7 = arith.muli %arg6, %c1_i32_8 : i32
      %c0_i32_9 = arith.constant 0 : i32
      %8 = arith.addi %c0_i32_9, %7 : i32
      %9 = arith.addi %0, %8 : i32
      %10 = arith.index_cast %9 : i32 to index
      %11 = memref.load %arg1[%10] : memref<16xi32, #tpu.memory_space<smem>>
      %c0_i32_10 = arith.constant 0 : i32
      %12 = tpu.memref_slice %arg2[%11, %c0_i32_10] : memref<512x128xf32, #tpu.memory_space<any>> -> memref<1x128xf32, #tpu.memory_space<any>>
      %c0_i32_11 = arith.constant 0 : i32
      %13 = tpu.memref_slice %arg4[%8, %c0_i32_11] : memref<16x128xf32, #tpu.memory_space<vmem>> -> memref<1x128xf32, #tpu.memory_space<vmem>>
      tpu.enqueue_dma source(%12 : memref<1x128xf32, #tpu.memory_space<any>>) target(%13 : memref<1x128xf32, #tpu.memory_space<vmem>>) target_semaphore(%arg5 : memref<!tpu.dma_semaphore, #tpu.memory_space<semaphore_mem>>)
    }
    %c16_i32_1 = arith.constant 16 : i32
    %c0_i32_2 = arith.constant 0 : i32
    %c16_i32_3 = arith.constant 16 : i32
    %2 = arith.addi %c0_i32_2, %c16_i32_3 : i32
    %c1_i32_4 = arith.constant 1 : i32
    scf.for %arg6 = %c0_i32_2 to %2 step %c1_i32_4  : i32 {
      %c0_i32_8 = arith.constant 0 : i32
      %c0_i32_9 = arith.constant 0 : i32
      %7 = tpu.memref_slice %arg2[%c0_i32_8, %c0_i32_9] : memref<512x128xf32, #tpu.memory_space<any>> -> memref<1x128xf32, #tpu.memory_space<any>>
      %c0_i32_10 = arith.constant 0 : i32
      %c0_i32_11 = arith.constant 0 : i32
      %8 = tpu.memref_slice %arg4[%c0_i32_10, %c0_i32_11] : memref<16x128xf32, #tpu.memory_space<vmem>> -> memref<1x128xf32, #tpu.memory_space<vmem>>
      tpu.wait_dma2 semaphore(%arg5 : memref<!tpu.dma_semaphore, #tpu.memory_space<semaphore_mem>>) src(%7 : memref<1x128xf32, #tpu.memory_space<any>>) dst(%8 : memref<1x128xf32, #tpu.memory_space<vmem>>)
    }
    %c0 = arith.constant 0 : index
    %c0_5 = arith.constant 0 : index
    %3 = vector.load %arg4[%c0, %c0_5] : memref<16x128xf32, #tpu.memory_space<vmem>>, vector<16x128xf32>
    %cst = arith.constant 11.3137083 : f32
    %4 = vector.broadcast %cst : f32 to vector<16x128xf32>
    %5 = arith.mulf %3, %4 : vector<16x128xf32>
    %c0_6 = arith.constant 0 : index
    %c0_7 = arith.constant 0 : index
    %6 = vector.load %arg3[%c0_6, %c0_7] : memref<16x128xf32, #tpu.memory_space<vmem>>, vector<16x128xf32>
    tpu.vector_store %arg3[%c0_6, %c0_7], %5 {strides = array<i32>} : memref<16x128xf32, #tpu.memory_space<vmem>>, vector<16x128xf32>,
    return
  }
  func.func @transform_1(%arg0: i32, %arg1: memref<16xi32, #tpu.memory_space<smem>>) -> (i32, i32) {
    %c0_i32 = arith.constant 0 : i32
    %c0_i32_0 = arith.constant 0 : i32
    return %arg0, %c0_i32 : i32, i32
  }
}

</mosaic_0001>

<bundles_post_ra>
// kernel: tpu_custom_call.1
= control target key start
LH: loop header
LB: loop body
LE: loop exit
PB: predicated region body
PF: predicated region fallthrough
CT: control target
= control target key end

     0   :  { %s248_s0 = inlined_call_operand.hbm [shape: s32[16], index: 0, kind: input, shape index: {}]   ;;  %s249_s1 = inlined_call_operand.hbm [shape: f32[512,128], index: 1, kind: input, shape index: {}]   ;;  %s250_s2 = inlined_call_operand.hbm [shape: f32[16,128], index: 2, kind: output, shape index: {}]  }
   0x1   :  { %s107_s11 = scalar_lea.hbm %s248_s0, 16 }
   0x2   :  { %p108_p0 = scmp.ne.s32.totalorder %s248_s0, %s107_s11  ;;  %p111_p1 = scmp.lt.u32.totalorder %s107_s11, %s248_s0 }
   0x4   :  { %p113_p2 = pnand %p111_p1, %p108_p0 }
   0x6   :  { %116 = shalt.err (!%p113_p2)  }
   0x7   :  { %s185_s16 = smov [#allocation5]  }
   0x8   :  { %8 = dma.hbm_to_smem %s248_s0, 16, %s185_s16, [#allocation4] }
   0x9   :  { %171 = dma.done.wait [#allocation4], 16 }
   0xa   :  { %172 = vsyncadd [#allocation4], 4294967280 }
   0xb   :  { %10 = sfence }
   0xc   :  { %11 = vsyncpa [#allocation7], 0  ;;  %s217_s19 = smov 0  }
   0xd LB: > { %s20_s20 = sld [smem:[#allocation5 + %s179_s19]]  ;;  %s23_s21 = scalar_lea.vmem [#allocation2], %s179_s19  ;;  %s179_s19 = sphi %s217_s19, %s18_s19  }
   0xe   : > { %s31_s22 = sshll.u32 %s23_s21, 4  ;;  %s119_s29 = scalar_lea.hbm %s249_s1, 8192  ;;  %s32_s22 = int_to_ptr.vmem [resolvable:$true] %s31_s22 }
  0x13   : > { %s85_s23 = sshll.u32 %s20_s20, 4 }
  0x14   : > { %s22_s25 = scalar_lea.hbm %s249_s1, %s85_s23 }
  0x15   : > { %s117_s26 = scalar_lea.hbm %s22_s25, 16  ;;  %p120_p4 = scmp.lt.u32.totalorder %s22_s25, %s249_s1 }
  0x16   : > { %p118_p3 = scmp.ne.s32.totalorder %s22_s25, %s117_s26  ;;  %p121_p5 = scmp.lt.u32.totalorder %s119_s29, %s117_s26 }
  0x17   : > { %p123_p7 = scmp.lt.u32.totalorder %s117_s26, %s22_s25 }
  0x18   : > { %p122_p6 = por %p121_p5, %p120_p4 }
  0x1a   : > { %p124_p8 = por %p123_p7, %p122_p6 }
  0x1c   : > { %p125_p9 = pnand %p124_p8, %p118_p3 }
  0x1e   : > { %128 = shalt.err (!%p125_p9)  }
  0x1f   : > { %s129_s4 = scalar_lea.vmem %s32_s22, 16  ;;  %s186_s5 = smov [#allocation2]  }
  0x20   : > { %p130_p10 = scmp.ne.s32.totalorder %s32_s22, %s129_s4  ;;  %s131_s6 = sshll.u32 %s186_s5, 4  ;;  %s132_s6 = int_to_ptr.vmem [resolvable:$false] %s131_s6 }
  0x21   : > { %s133_s7 = scalar_lea.vmem %s132_s6, 256  ;;  %p134_p11 = scmp.lt.s32.totalorder %s32_s22, %s132_s6 }
  0x22   : > { %p135_p12 = scmp.lt.s32.totalorder %s133_s7, %s129_s4 }
  0x24   : > { %p136_p13 = por %p135_p12, %p134_p11 }
  0x26   : > { %p137_p0 = pnand %p136_p13, %p130_p10 }
  0x28   : > { %140 = shalt.err (!%p137_p0)  }
  0x29   : > { %34 = dma.hbm_to_vmem [thread:$0]  %s22_s25, 16, %s32_s22, [#allocation3] }
  0x2a   : > { %s18_s19 = sadd.s32 1, %s179_s19  }
  0x2b   : > { %p15_p1 = scmp.ge.s32.totalorder %s18_s19, 16  }
  0x2c   :  { %s181_s8 = smov (%p15_p1), 0  }
  0x2d   :  { %17 = sbr.rel (!%p15_p1) target bundleno = 13 (0xd), region = 40 }
  0x34 LB: > { %173 = dma.done.wait [#allocation3], 16  ;;  %s183_s8 = sphi %s181_s8, %s40_s8  }
  0x35   : > { %174 = vsyncadd [#allocation3], 4294967280  ;;  %s40_s8 = sadd.s32 1, %s183_s8  }
  0x36   : > { %p37_p2 = scmp.ge.s32.totalorder %s40_s8, 16  }
  0x37   :  { %v44_v0 = vld [vmem:[#allocation2] sm:$0xff] (%p37_p2)  ;;  %v45_v1 = vld [vmem:[#allocation2 + $0x8] sm:$0xff] (%p37_p2)  ;;  %s187_s9 = smov (%p37_p2), [#allocation6]  }
  0x38   :  { %39 = sbr.rel (!%p37_p2) target bundleno = 52 (0x34), region = 51  ;;  %v46_v2 = vmul.f32 (%p37_p2), 11.313708, %v44_v0  ;;  %v47_v3 = vmul.f32 (%p37_p2), 11.313708, %v45_v1  ;;  %s55_s10 = sshll.u32 (%p37_p2), %s187_s9, 4  ;;  %s56_s10 = int_to_ptr.vmem [resolvable:$true] %s55_s10 }
  0x39   :  { %s141_s11 = scalar_lea.vmem (%p37_p2), %s56_s10, 256  ;;  %p146_p4 = scmp.lt.s32.totalorder (%p37_p2), %s56_s10, %s56_s10 }
  0x3a   :  { %48 = vst [vmem:[#allocation6] sm:$0xff] (%p37_p2), %v46_v2  ;;  %49 = vst [vmem:[#allocation6 + $0x8] sm:$0xff] (%p37_p2), %v47_v3  ;;  %p142_p3 = scmp.ne.s32.totalorder (%p37_p2), %s56_s10, %s141_s11  ;;  %p147_p5 = scmp.lt.s32.totalorder (%p37_p2), %s141_s11, %s141_s11 }
  0x3c   :  { %p148_p6 = por (%p37_p2), %p147_p5, %p146_p4 }
  0x3e   :  { %p149_p7 = pnand (%p37_p2), %p148_p6, %p142_p3 }
  0x40   :  { %152 = shalt.err (!%p149_p7)
}
  0x41   :  { %s153_s13 = scalar_lea.hbm %s250_s2, 256 }
  0x42   :  { %p154_p8 = scmp.ne.s32.totalorder %s250_s2, %s153_s13  ;;  %p157_p9 = scmp.lt.u32.totalorder %s153_s13, %s250_s2 }
  0x44   :  { %p159_p10 = pnand %p157_p9, %p154_p8 }
  0x46   :  { %162 = shalt.err (!%p159_p10)
}
  0x47   :  { %s188_s18 = smov 128   ;;  %s189_s19 = smov 8  }
  0x48   :  { %61 = dma.vmem_to_hbm [thread:$0]  %s56_s10, 256, %s250_s2, [#allocation7], %s188_s18, %s188_s18, %s189_s19  }
  0x49   :  { %175 = dma.done.wait [#allocation7], 256  }
  0x4a   :  { %176 = vsyncadd [#allocation7], 4294967040 }
  0x4b   :  { %65 = vsyncpa [#allocation7], 1 }
  0x4c   :  { %66 = vsyncmov [#allocation3] }
  0x4f   :  { %s67_s22 = vpop.sfrf %66 }
  0x50   :  { %p86_p11 = scmp.ne.s32.totalorder %s67_s22, 0 }
  0x52   :  { %71 = shalt.err (%p86_p11)  }

</bundles_post_ra>
